<compile_context>
chip_gen: v6e
topology: v6e:2x2x1
jax: 0.10.0
libtpu: 0.0.40
codegen_flags: <defaults>
</compile_context>

<pallas_src>
import math

import numpy as np
import jax
import jax.numpy as jnp
from jax import lax
from jax.experimental import pallas as pl
from jax.experimental.pallas import tpu as pltpu

ROOT_2 = 1.41421  # same truncated constant as the PyTorch module (kept for exact semantics)
# Defined in the PyTorch module but never applied in its forward pass (kept for fidelity).
LEAKY_RELU_GAIN = float(np.sqrt(2.0 / (1.0 + 0.2 ** 2)))


# --------------------------------------------------------------------------------------------
# Pre-pass kernel: per-batch weight modulation + demodulation.
#   style_ref : (1, 1, kkC)   style_std tiled over the k*k taps (channel-fastest layout)
#   wk_ref    : (C_out, kkC)  base conv weight, flat index (kh*k + kw)*C_in + c
#   wn_ref    : (1, C_out, kkC) demodulated per-batch weight (f32)
# --------------------------------------------------------------------------------------------
def _modulate_kernel(style_ref, wk_ref, wn_ref):
    wm = wk_ref[...] * style_ref[0]                                        # (C_out, kkC)
    inv_norm = lax.rsqrt(jnp.sum(wm * wm, axis=1, keepdims=True) + 1e-8)   # EUP rsqrt, f32
    wn_ref[0] = (wm * inv_norm).astype(wn_ref.dtype)


# --------------------------------------------------------------------------------------------
# Hot kernel: grouped modulated conv (k matmuls, K = k*C_in), bias + noise, LeakyReLU,
# optional residual (/sqrt(2)), optional 1x1 toRGB conv.  Grid = (batch, hw_tile); no
# cross-step carry, so both grid axes are "parallel".
# --------------------------------------------------------------------------------------------
def _make_conv_kernel(k, p, W, use_t, has_out):
    def kernel(*refs):
        wn_ref, x_ref, bias_ref, nscale_ref, noise_ref = refs[:5]
        idx = 5
        t_ref = None
        if use_t:
            t_ref = refs[idx]; idx += 1
        if has_out:
            wout_ref, bout_ref = refs[idx], refs[idx + 1]; idx += 2
        y_ref = refs[idx]; idx += 1
        rgb_ref = refs[idx] if has_out else None

        xt = x_ref[0]                                   # (k*C_in, T) in compute dtype
        T = xt.shape[-1]
        C_out = y_ref.shape[1]
        # lane index -> column inside the image row; valid because T % W == 0
        col = lax.broadcasted_iota(jnp.int32, (1, T), 1) % W

        acc = jnp.zeros((C_out, T), jnp.float32)
        for kw in range(k):                             # static unroll (k is small)
            s = kw - p                                  # horizontal tap offset
            if s == 0:
                tap = xt
            else:
                # circular lane roll (XLU slot) + mask re-creating the zero column padding
                # and killing the wrap-around at row / tile boundaries.
                rolled = pltpu.roll(xt, shift=(-s) % T, axis=1)
                keep = jnp.logical_and(col + s >= 0, col + s < W)
                tap = jnp.where(keep, rolled, jnp.zeros_like(rolled))
            acc = acc + jnp.dot(wn_ref[0, kw], tap,
                                preferred_element_type=jnp.float32)        # (C_out, T) f32

        # epilogue in f32 (v5e has no bf16 VPU/EUP path; free filler under the MXU anyway)
        y = acc + bias_ref[...] + nscale_ref[...] * noise_ref[0]
        y = jnp.where(y >= 0, y, 0.2 * y)               # LeakyReLU(0.2)
        if use_t:                                       # residual only when out=True (PyTorch)
            y = (y + t_ref[0]) * (1.0 / ROOT_2)
        y_ref[0] = y.astype(y_ref.dtype)

        if has_out:
            # 1x1 toRGB conv == channel matmul; out_weight_scale folded into wout in wrapper
            rgb = jnp.dot(wout_ref[...], y, preferred_element_type=jnp.float32)
            rgb_ref[0] = (rgb + bout_ref[...]).astype(rgb_ref.dtype)

    return kernel


def _choose_hw_tile(HW, W, bytes_per_lane, max_tile_bytes, max_lanes=16384):
    """Largest lane tile dividing HW, multiple of W and (preferably) 256, within the budget."""
    cap = max(128, min(max_lanes, max_tile_bytes // max(bytes_per_lane, 1)))
    if HW <= cap:
        return HW
    for base in (256, 128):            # v6e/v7x MXU wants N >= 256; 128 is the v5e floor
        step = base * W // math.gcd(base, W)     # lcm(base, W)
        t = (cap // step) * step
        while t >= step:
            if HW % t == 0:
                return t
            t -= step
    return HW                          # single spatial tile fallback


def modulated_conv_block(x, style_base, params, noise_key, *, kernel_size,
                         up=False, out=True, t=None, hw_tile=None,
                         compute_dtype=jnp.bfloat16):
    weight = params["conv_weight"]          # (C_out, C_in, k, k)
    bias = params["conv_bias"]              # (C_out,)
    aw = params["affine_weight"]            # (S, C_in)  (torch Linear weight, transposed)
    ab = params["affine_bias"]              # (C_in,)
    nscale = params["noise_scalar"]         # (C_out,)

    B, C_in, H, W = x.shape
    C_out = weight.shape[0]
    S = style_base.shape[1]
    k = kernel_size
    p = (k - 1) // 2
    kC = k * C_in
    kkC = k * kC
    use_t = out and (t is not None)         # PyTorch only applies t inside `if self.out:`

    if up:
        # bilinear x2 upsample (align_corners=False semantics) kept as plain-JAX glue
        H, W = 2 * H, 2 * W
        x = jax.image.resize(x, (B, C_in, H, W), method="bilinear")
    HW = H * W

    # make_noise_img equivalent (torch used numpy RNG; deterministic jax PRNG here).
    # TODO(synk): could be generated in-kernel with pltpu.prng_seed/prng_random_bits to drop
    # this HBM stream; kept outside so kernel and pure-JAX reference share one RNG stream.
    noise = jax.random.normal(noise_key, (B, 1, H, W), jnp.float32).reshape(B, 1, HW)

    # generation-aware VMEM budget (v7x has only 64 MiB physical VMEM)
    try:
        vmem_cap = int(pltpu.get_tpu_info().vmem_capacity_bytes)
    except Exception:
        vmem_cap = 64 << 20
    hard_cap = (vmem_cap * 3) // 4

    # ---- pre-pass: style affine (tiny, plain JAX) + per-batch modulation/demod (Pallas) ----
    # 1/sqrt(S) folded into the affine; result tiled over the k*k taps (channel-fastest) so
    # the in-kernel modulation is a plain row broadcast.
    style_std = (style_base * (1.0 / float(np.sqrt(S)))) @ aw + ab + 1.0       # (B, C_in)
    style_t = jnp.tile(style_std, (1, k * k)).reshape(B, 1, kkC).astype(jnp.float32)
    wk = jnp.transpose(weight, (0, 2, 3, 1)).reshape(C_out, kkC)               # (C_out,(kh,kw,c))

    pre_vmem = int(min(hard_cap, max(32 << 20, 6 * C_out * kkC * 4 + (8 << 20))))
    wn_flat = pl.pallas_call(
        _modulate_kernel,
        grid=(B,),
        in_specs=[pl.BlockSpec((1, 1, kkC), lambda b: (b, 0, 0)),
                  pl.BlockSpec((C_out, kkC), lambda b: (0, 0))],
        out_specs=pl.BlockSpec((1, C_out, kkC), lambda b: (b, 0, 0)),
        out_shape=jax.ShapeDtypeStruct((B, C_out, kkC), jnp.float32),
        compiler_params=pltpu.CompilerParams(
            dimension_semantics=("parallel",), vmem_limit_bytes=pre_vmem),
    )(style_t, wk)

    # reorder to (B, kw, C_out, kh*C_in + c) and cast the matmul operand (tiny glue tensor)
    wn = (wn_flat.reshape(B, C_out, k, k, C_in)
                 .transpose(0, 3, 1, 2, 4)
                 .reshape(B, k, C_out, kC)
                 .astype(compute_dtype))

    # ---- row-tap materialization: only k h-shifted copies (k x HBM, not k^2 x);
    # the kw shifts are reconstructed in-kernel with pltpu.roll + lane masks.
    x_pad_h = jnp.pad(x, ((0, 0), (0, 0), (p, p), (0, 0)))
    x_rows = jnp.concatenate([x_pad_h[:, :, kh:kh + H, :] for kh in range(k)], axis=1)
    x_rows = x_rows.reshape(B, kC, HW).astype(compute_dtype)

    # ---- spatial tiling (lane-dense; T % W == 0 so rows never straddle a tile edge) ----
    itemsize = jnp.dtype(compute_dtype).itemsize
    bytes_per_lane = (kC * itemsize + 4 + C_out * 4
                      + (C_out * 4 if use_t else 0) + (3 * 4 if out else 0))
    tile_budget = max(1 << 20, min(12 << 20, hard_cap // 6))
    T = hw_tile if hw_tile is not None else _choose_hw_tile(HW, W, bytes_per_lane, tile_budget)
    assert HW % T == 0 and T % W == 0 and (T == HW or T % 128 == 0), (HW, W, T)
    n_hw = HW // T

    args = [wn, x_rows, bias.reshape(C_out, 1), nscale.reshape(C_out, 1), noise]
    # TODO(synk): constant-index_map inputs (bias/nscale/wout/bout) could be single-buffered via
    # pipeline_mode=pl.Buffered(1) for extra VMEM headroom at 512-channel scale.
    in_specs = [
        pl.BlockSpec((1, k, C_out, kC), lambda b, h: (b, 0, 0, 0)),
        pl.BlockSpec((1, kC, T), lambda b, h: (b, 0, h)),
        pl.BlockSpec((C_out, 1), lambda b, h: (0, 0)),
        pl.BlockSpec((C_out, 1), lambda b, h: (0, 0)),
        pl.BlockSpec((1, 1, T), lambda b, h: (b, 0, h)),
    ]
    if use_t:
        args.append(t.reshape(B, C_out, HW))
        in_specs.append(pl.BlockSpec((1, C_out, T), lambda b, h: (b, 0, h)))
    if out:
        # 1x1 toRGB conv weights with out_weight_scale (1/sqrt(C_out)) folded in
        wout = params["out_weight"].reshape(3, C_out) * (1.0 / float(np.sqrt(C_out)))
        args += [wout, params["out_bias"].reshape(3, 1)]
        in_specs += [pl.BlockSpec((3, C_out), lambda b, h: (0, 0)),
                     pl.BlockSpec((3, 1), lambda b, h: (0, 0))]

    # TODO(synk): y (and t) could be carried in bf16 end-to-end if downstream accepts it.
    out_shapes = [jax.ShapeDtypeStruct((B, C_out, HW), x.dtype)]
    out_specs = [pl.BlockSpec((1, C_out, T), lambda b, h: (b, 0, h))]
    if out:
        out_shapes.append(jax.ShapeDtypeStruct((B, 3, HW), x.dtype))
        out_specs.append(pl.BlockSpec((1, 3, T), lambda b, h: (b, 0, h)))

    resident = 4 * (5 * C_out + 3) + itemsize * k * C_out * kC      # bias/nscale/wout/bout + wn
    est = 4 * (resident + bytes_per_lane * T) + (4 << 20)           # ~2x buffering + slack
    vmem_limit = int(min(hard_cap, max(32 << 20, est)))

    res = pl.pallas_call(
        _make_conv_kernel(k, p, W, use_t, out),
        grid=(B, n_hw),
        in_specs=in_specs,
        out_specs=tuple(out_specs),
        out_shape=tuple(out_shapes),
        compiler_params=pltpu.CompilerParams(
            # no cross-step carry -> both axes parallel (v7x megacore can split over HW too)
            dimension_semantics=("parallel", "parallel"),
            vmem_limit_bytes=vmem_limit),
    )(*args)

    y = res[0].reshape(B, C_out, H, W)
    if out:
        return y, res[1].reshape(B, 3, H, W)
    return y, None


def reference(x, style_base, params, noise_key, *, kernel_size, up=False, out=True, t=None):
    """Pure-JAX reference mirroring the PyTorch forward exactly."""
    weight, bias = params["conv_weight"], params["conv_bias"]
    aw, ab, nscale = params["affine_weight"], params["affine_bias"], params["noise_scalar"]
    B, C_in, H, W = x.shape
    C_out = weight.shape[0]
    S = style_base.shape[1]
    k = kernel_size
    p = (k - 1) // 2
    if up:
        H, W = 2 * H, 2 * W
        x = jax.image.resize(x, (B, C_in, H, W), method="bilinear")
    noise = jax.random.normal(noise_key, (B, 1, H, W), dtype=jnp.float32)

    style_std = (style_base * (1.0 / np.sqrt(S))) @ aw + ab + 1.0      # (B, C_in)
    w = weight[None] * style_std[:, None, :, None, None]               # (B, C_out, C_in, k, k)
    w = w / jnp.sqrt(jnp.sum(w * w, axis=(2, 3, 4), keepdims=True) + 1e-8)
    y = lax.conv_general_dilated(
        x.reshape(1, B * C_in, H, W), w.reshape(B * C_out, C_in, k, k),
        window_strides=(1, 1), padding=((p, p), (p, p)),
        feature_group_count=B, dimension_numbers=("NCHW", "OIHW", "NCHW"))
    y = y.reshape(B, C_out, H, W) + bias.reshape(1, C_out, 1, 1)
    y = y + nscale.reshape(1, C_out, 1, 1) * noise
    y = jnp.where(y >= 0, y, 0.2 * y)
    if out:
        if t is not None:
            y = (y + t) / ROOT_2
        rgb = lax.conv_general_dilated(
            y * (1.0 / np.sqrt(C_out)), params["out_weight"],
            window_strides=(1, 1), padding=((0, 0), (0, 0)),
            dimension_numbers=("NCHW", "OIHW", "NCHW"))
        rgb = rgb + params["out_bias"].reshape(1, 3, 1, 1)
        return y, rgb
    return y, None


if __name__ == "__main__":
    # Config: in_channels=4, out_channels=8, kernel_size=3, style_size=32, H=W=16.
    B, C_in, C_out, k, S, H = 2, 4, 8, 3, 32, 16
    key = jax.random.PRNGKey(0)
    ks = jax.random.split(key, 12)
    params = {
        "conv_weight": jax.random.normal(ks[0], (C_out, C_in, k, k), jnp.float32),
        "conv_bias": jnp.zeros((C_out,), jnp.float32),        # torch init: zeros
        "affine_weight": jax.random.normal(ks[1], (S, C_in), jnp.float32) / np.sqrt(S),
        "affine_bias": 0.1 * jax.random.normal(ks[2], (C_in,), jnp.float32),
        # torch initializes noise_scalar to zeros; small nonzero values exercise the path
        "noise_scalar": 0.1 * jax.random.normal(ks[3], (C_out,), jnp.float32),
        "out_weight": jax.random.normal(ks[4], (3, C_out, 1, 1), jnp.float32) / np.sqrt(C_out),
        "out_bias": 0.1 * jax.random.normal(ks[5], (3,), jnp.float32),
    }
    x = jax.random.normal(ks[6], (B, C_in, H, H), jnp.float32)
    style_base = jax.random.normal(ks[7], (B, S), jnp.float32)
    noise_key = ks[8]
    t_res = jax.random.normal(ks[9], (B, C_out, 2 * H, 2 * H), jnp.float32)

    # Case 1a: "LATTER" block (out=True), bf16 operands, forced 2 spatial tiles
    # (exercises the in-kernel roll masking across tile/row boundaries).
    y, rgb = modulated_conv_block(x, style_base, params, noise_key,
                                  kernel_size=k, up=False, out=True, t=None, hw_tile=128)
    y_ref, rgb_ref = reference(x, style_base, params, noise_key,
                               kernel_size=k, up=False, out=True, t=None)
    np.testing.assert_allclose(np.asarray(y), np.asarray(y_ref), rtol=5e-2, atol=5e-2)
    np.testing.assert_allclose(np.asarray(rgb), np.asarray(rgb_ref), rtol=5e-2, atol=5e-2)

    # Case 1b: same config with f32 operands -> tight tolerance (validates tap/roll layout exactly)
    y32, rgb32 = modulated_conv_block(x, style_base, params, noise_key,
                                      kernel_size=k, up=False, out=True, t=None,
                                      hw_tile=128, compute_dtype=jnp.float32)
    np.testing.assert_allclose(np.asarray(y32), np.asarray(y_ref), rtol=1e-3, atol=1e-3)
    np.testing.assert_allclose(np.asarray(rgb32), np.asarray(rgb_ref), rtol=1e-3, atol=1e-3)

    # Case 2: up=True with residual t (out=True), bf16 operands, default tiling
    y2, rgb2 = modulated_conv_block(x, style_base, params, noise_key,
                                    kernel_size=k, up=True, out=True, t=t_res)
    y2_ref, rgb2_ref = reference(x, style_base, params, noise_key,
                                 kernel_size=k, up=True, out=True, t=t_res)
    np.testing.assert_allclose(np.asarray(y2), np.asarray(y2_ref), rtol=5e-2, atol=5e-2)
    np.testing.assert_allclose(np.asarray(rgb2), np.asarray(rgb2_ref), rtol=5e-2, atol=5e-2)

    # Case 3: "FORMER" block (out=False) -> only y, residual ignored
    y3, _ = modulated_conv_block(x, style_base, params, noise_key,
                                 kernel_size=k, up=False, out=False, t=None)
    y3_ref, _ = reference(x, style_base, params, noise_key,
                          kernel_size=k, up=False, out=False, t=None)
    np.testing.assert_allclose(np.asarray(y3), np.asarray(y3_ref), rtol=5e-2, atol=5e-2)

    jax.block_until_ready((y, rgb, y32, rgb32, y2, rgb2, y3))
    print("KERNEL_OK")
</pallas_src>

<mosaic_0001>
module attributes {stable_mosaic.version = 11 : i64} {
  func.func @_modulate_kernel(%arg0: i32, %arg1: memref<1x1x36xf32, #tpu.memory_space<vmem>>, %arg2: memref<8x36xf32, #tpu.memory_space<vmem>>, %arg3: memref<1x8x36xf32, #tpu.memory_space<vmem>>) attributes {dimension_semantics = [#tpu.dimension_semantics<parallel>], iteration_bounds = array<i64: 2>, scalar_prefetch = 0 : i64, scratch_operands = 0 : i64, tpu.core_type = #tpu.core_type<tc>, window_params = [{transform_indices = @transform_0, window_bounds = array<i64: 1, 1, 36>}, {pipeline_mode = #tpu.pipeline_mode<synchronous>, transform_indices = @transform_1, window_bounds = array<i64: 8, 36>}, {transform_indices = @transform_2, window_bounds = array<i64: 1, 8, 36>}]} {
    %c0 = arith.constant 0 : index
    %c0_0 = arith.constant 0 : index
    %0 = vector.load %arg2[%c0, %c0_0] : memref<8x36xf32, #tpu.memory_space<vmem>>, vector<8x36xf32>
    %c0_1 = arith.constant 0 : index
    %c0_2 = arith.constant 0 : index
    %c0_3 = arith.constant 0 : index
    %1 = vector.load %arg1[%c0_1, %c0_2, %c0_3] : memref<1x1x36xf32, #tpu.memory_space<vmem>>, vector<1x1x36xf32>
    %2 = vector.shape_cast %1 : vector<1x1x36xf32> to vector<1x36xf32>
    %3 = vector.broadcast %2 : vector<1x36xf32> to vector<8x36xf32>
    %4 = arith.mulf %0, %3 : vector<8x36xf32>
    %5 = arith.mulf %4, %4 : vector<8x36xf32>
    %cst = arith.constant dense<0.000000e+00> : vector<8xf32>
    %6 = vector.multi_reduction <add>, %5, %cst [1] : vector<8x36xf32> to vector<8xf32>
    %7 = vector.shape_cast %6 : vector<8xf32> to vector<8x1xf32>
    %cst_4 = arith.constant 9.99999993E-9 : f32
    %8 = vector.broadcast %cst_4 : f32 to vector<8x1xf32>
    %9 = arith.addf %7, %8 : vector<8x1xf32>
    %10 = math.rsqrt %9 : vector<8x1xf32>
    %11 = vector.broadcast %10 : vector<8x1xf32> to vector<8x36xf32>
    %12 = arith.mulf %4, %11 : vector<8x36xf32>
    %c0_5 = arith.constant 0 : index
    %c0_6 = arith.constant 0 : index
    %c0_7 = arith.constant 0 : index
    %13 = vector.load %arg3[%c0_5, %c0_6, %c0_7] : memref<1x8x36xf32, #tpu.memory_space<vmem>>, vector<1x8x36xf32>
    %14 = vector.shape_cast %13 : vector<1x8x36xf32> to vector<8x36xf32>
    %15 = vector.shape_cast %12 : vector<8x36xf32> to vector<1x8x36xf32>
    tpu.vector_store %arg3[%c0_5, %c0_6, %c0_7], %15 {strides = array<i32>} : memref<1x8x36xf32, #tpu.memory_space<vmem>>, vector<1x8x36xf32>,
    return
  }
  func.func @transform_0(%arg0: i32) -> (i32, i32, i32) {
    %c0_i32 = arith.constant 0 : i32
    %c0_i32_0 = arith.constant 0 : i32
    %c0_i32_1 = arith.constant 0 : i32
    return %arg0, %c0_i32, %c0_i32_0 : i32, i32, i32
  }
  func.func @transform_1(%arg0: i32) -> (i32, i32) {
    %c0_i32 = arith.constant 0 : i32
    %c0_i32_0 = arith.constant 0 : i32
    %c0_i32_1 = arith.constant 0 : i32
    return %c0_i32, %c0_i32_0 : i32, i32
  }
  func.func @transform_2(%arg0: i32) -> (i32, i32, i32) {
    %c0_i32 = arith.constant 0 : i32
    %c0_i32_0 = arith.constant 0 : i32
    %c0_i32_1 = arith.constant 0 : i32
    return %arg0, %c0_i32, %c0_i32_0 : i32, i32, i32
  }
}

</mosaic_0001>

<bundles_post_ra>
// kernel: tpu_custom_call.1
= control target key start
LH: loop header
LB: loop body
LE: loop exit
PB: predicated region body
PF: predicated region fallthrough
CT: control target
= control target key end

     0   :  { %7 = vsyncpa [#allocation3], 0  ;;  %s659_s0 = inlined_call_operand.hbm [shape: f32[2,1,36], index: 0, kind: input, shape index: {}]   ;;  %s660_s1 = inlined_call_operand.hbm [shape: f32[8,36], index: 1, kind: input, shape index: {}]   ;;  %s661_s2 = inlined_call_operand.hbm [shape: f32[2,8,36], index: 2, kind: output, shape index: {}]  }
   0x1   :  { %9 = vsyncpa [#allocation3 + $0x1], 0 }
   0x2   :  { %10 = vsyncpa [#allocation6], 0 }
   0x3   :  { %11 = vsyncpa [#allocation4], 0 }
   0x4   :  { %13 = vsyncpa [#allocation4 + $0x1], 0  ;;  %s492_s9 = smov 0   ;;  %s494_s10 = smov 0  }
   0x5   :  { %s496_s11 = smov 0   ;;  %s498_s12 = smov 0  }
   0x6 LB: > { %s513_s13 = sadd.s32 4294967295, %s472_s12   ;;  %s278_s14 = sadd.s32 4294967294, %s472_s12   ;;  %s472_s12 = sphi %s498_s12, %s684_s12   ;;  %s468_s11 = sphi %s496_s11, %s683_s11   ;;  %s464_s10 = sphi %s494_s10, %s682_s10   ;;  %s460_s9 = sphi %s492_s9, %s681_s9  }
   0x7   : > { %p39_p0 = scmp.ne.s32.totalorder %s464_s10, %s460_s9  ;;  %p662_p1 = scmp.eq.s32.totalorder %s513_s13, 0 }
   0x8   : > { %p90_p3 = scmp.eq.s32.totalorder %s278_s14, 1  ;;  %p279_p5 = scmp.ge.s32.totalorder %s472_s12, 1 }
   0x9   : > { %p522_p4 = por %p662_p1, %p39_p0  ;;  %p97_p7 = scmp.lt.s32.totalorder %s472_s12, 3 }
   0xa   : > { %p527_p6 = por %p90_p3, %p39_p0  ;;  %s474_s18 = smov [#allocation5]  }
   0xb   : > { %s666_s15 = scalar_select %p522_p4, 1, 0 }
   0xc   : > { %s667_s16 = scalar_select %p527_p6, 1, 0 }
   0xd   : > { %p532_p8 = pnand %p279_p5, %p97_p7  ;;  %s110_s19 = sshll.u32 %s474_s18, 4  ;;  %s111_s19 = int_to_ptr.vmem [resolvable:$true] %s110_s19 }
   0xe   : > { %s540_s20 = sadd.s32 1, %s472_s12   ;;  %s26_s24 = sadd.s32 1, %s468_s11 }
   0xf   : > { %s668_s17 = scalar_select %p532_p8, 1, 0 }
  0x10   : > { %p299_p10 = pneg %p532_p8  ;;  %s23_s22 = ssub.s32 %s472_s12, %s540_s20 }
  0x11   : > { %p550_p12 = scmp.eq.s32.totalorder %s23_s22, 0  ;;  %p33_p13 = scmp.ne.s32.totalorder %s468_s11, %s464_s10 }
  0x12   : > { %p544_p11 = pnand %p299_p10, %p662_p1  ;;  %s361_s25 = scalar_lea.vmem %s111_s19, 128 }
  0x13   : > { %p362_p3 = scmp.ne.s32.totalorder %s111_s19, %s361_s25  ;;  %p369_p9 = scmp.lt.s32.totalorder %s111_s19, %s111_s19 }
  0x14   : > { %p352_p0 = pneg %p544_p11  ;;  %p370_p2 = scmp.lt.s32.totalorder %s361_s25, %s361_s25 }
  0x16   : > { %p364_p5 = pnand %p362_p3, %p352_p0  ;;  %p371_p10 = por %p370_p2, %p369_p9 }
  0x18   : > { %p365_p7 = pneg %p364_p5 }
  0x1a   : > { %p372_p1 = pnand %p371_p10, %p365_p7 }
  0x1c   : > { %375 = shalt.err (!%p372_p1)
}
  0x1d   : > { %302 = dma.hbm_to_vmem [thread:$0]  (!%p544_p11), %s660_s1, 128, %s111_s19, [#allocation6]  }
  0x1e   : > { %s567_s28 = scalar_select %p550_p12, %s468_s11, %s26_s24  }
  0x1f   : > { %p34_p1 = scmp.eq.s32.totalorder %s472_s12, 0  ;;  %p671_p2 = scmp.eq.s32.totalorder %s513_s13, 1 }
  0x20   : > { %p312_p0 = scmp.lt.s32.totalorder %s472_s12, 2  ;;  %s121_s30 = sand.u32 1, %s468_s11  }
  0x21   : > { %p575_p9 = por %p671_p2, %p33_p13  ;;  %p35_p3 = por %p34_p1, %p33_p13 }
  0x22   : > { %s282_s3 = sshll.u32 %s472_s12, 4  ;;  %s124_s7 = scalar_lea.vmem [#allocation2], %s121_s30 }
  0x23   : > { %s672_s29 = scalar_select %p575_p9, 1, 0 }
  0x24   : > { %s588_s6 = scalar_lea.hbm %s659_s0, %s282_s3  ;;  %s131_s8 = sshll.u32 %s124_s7, 4  ;;  %s132_s8 = int_to_ptr.vmem [resolvable:$true] %s131_s8 }
  0x25   : > { %p590_p11 = pnand %p312_p0, %p35_p3  ;;  %s122_s18 = scalar_lea.sflag [#allocation3], %s121_s30 }
  0x26   : > { %s376_s19 = scalar_lea.hbm %s588_s6, 16  ;;  %s381_s23 = scalar_lea.hbm %s659_s0, 32 }
  0x27   : > { %p377_p12 = scmp.ne.s32.totalorder %s588_s6, %s376_s19  ;;  %p378_p13 = pneg %p590_p11 }
  0x28   : > { %p382_p10 = scmp.lt.s32.totalorder %s588_s6, %s659_s0  ;;  %p383_p1 = scmp.lt.s32.totalorder %s381_s23, %s376_s19 }
  0x29   : > { %p379_p5 = pnand %p378_p13, %p377_p12 }
  0x2a   : > { %p384_p2 = por %p383_p1, %p382_p10 }
  0x2b   : > { %p380_p7 = pneg %p379_p5 }
  0x2d   : > { %p385_p0 = pnand %p384_p2, %p380_p7 }
  0x2f   : > { %388 = shalt.err (!%p385_p0)
}
  0x30   : > { %s389_s26 = scalar_lea.vmem %s132_s8, 16  ;;  %s475_s27 = smov [#allocation2]  }
  0x31   : > { %p390_p3 = scmp.ne.s32.totalorder %s132_s8, %s389_s26  ;;  %s394_s30 = sshll.u32 %s475_s27, 4  ;;  %s395_s30 = int_to_ptr.vmem [resolvable:$false] %s394_s30 }
  0x32   : > { %s396_s3 = scalar_lea.vmem %s395_s30, 32  ;;  %p397_p12 = scmp.lt.s32.totalorder %s132_s8, %s395_s30 }
  0x33   : > { %p392_p6 = pnand %p390_p3, %p378_p13  ;;  %p398_p5 = scmp.lt.s32.totalorder %s396_s3, %s389_s26 }
  0x35   : > { %p393_p9 = pneg %p392_p6  ;;  %p399_p4 = por %p398_p5, %p397_p12 }
  0x37   : > { %p400_p8 = pnand %p399_p4, %p393_p9 }
  0x39   : > { %403 = shalt.err (!%p400_p8)
}
  0x3a   : > { %306 = dma.hbm_to_vmem [thread:$0]  (!%p590_p11), %s588_s6, 16, %s132_s8, %s122_s18  }
  0x3b   : > { %p674_p7 = scmp.ne.s32.totalorder %s668_s17, 0 }
  0x3c   : > { %s611_s4 = sand.u32 (!%p674_p7), 1, %s464_s10   ;;  %p675_p6 = scmp.ne.s32.totalorder (!%p674_p7), %s666_s15, 0 }
  0x3d   : > { %140 = sbr.rel (%p674_p7) target bundleno = 245 (0xf5), region = 28  ;;  %s143_s5 = scalar_lea.sflag (!%p674_p7), [#allocation3], %s611_s4 }
  0x3e   : > { %s145_s7 = scalar_lea.vmem (!%p674_p7), [#allocation2], %s611_s4 }
  0x42   : > { %447 = dma.done.wait (%p675_p6), %s143_s5, 16  }
  0x43   : > { %449 = vsyncadd (%p675_p6), %s143_s5, 4294967280  ;;  %p676_p4 = scmp.eq.s32.totalorder %s513_s13, 0 }
  0x45   : > { %451 = dma.done.wait (%p676_p4), [#allocation6], 128   ;;  %p677_p8 = pmov %p676_p4 }
  0x46   : > { %v169_v0 = vld [vmem:[#allocation5] sm:$0xff]  ;;  %v286_v1 = vld [vmem:[%s145_s7] ss:$0 sm:$0xff]  ;;  %vm179_vm0 = vcmask 293888   ;;  %s285_s15 = sshll.u32 %s611_s4, 3  ;;  %s288_s17 = sshll.u32 %s513_s13, 7 }
  0x47   : > { %453 = vsyncadd (%p677_p8), [#allocation6], 4294967168  ;;  %v177_v2 = vmul.f32 %v286_v1, %v169_v0  ;;  %s168_s6 = scalar_lea.vmem [#allocation7], %s285_s15  ;;  %s199_s19 = scalar_lea.hbm %s661_s2, %s288_s17 }
  0x48   : > { %s201_s8 = sshll.u32 %s168_s6, 4  ;;  %s188_s21 = scalar_lea.sflag [#allocation4], %s611_s4  ;;  %s202_s8 = int_to_ptr.vmem [resolvable:$true] %s201_s8 }
  0x49   : > { %v178_v3 = vmul.f32 %v177_v2, %v177_v2  ;;  %s404_s22 = scalar_lea.vmem %s202_s8, 128  ;;  %p678_p11 = scmp.ne.s32.totalorder %s672_s29, 0 }
  0x4a   : > { %p405_p9 = scmp.ne.s32.totalorder %s202_s8, %s404_s22  ;;  %s476_s23 = smov [#allocation7]  }
  0x4b   : > { %v180_v4 = vsel %vm179_vm0, %v178_v3, 0.0  ;;  %s408_s24 = sshll.u32 %s476_s23, 4  ;;  %s409_s24 = int_to_ptr.vmem [resolvable:$false] %s408_s24 }
  0x4c   : > { %181 = vadd.xlane.f32.xlu0 %v180_v4  ;;  %p406_p13 = pnand %p405_p9, %p678_p11  ;;  %s410_s13 = scalar_lea.vmem %s409_s24, 256 }
  0x4d   : > { %p411_p1 = scmp.lt.s32.totalorder %s202_s8, %s409_s24  ;;  %p412_p2 = scmp.lt.s32.totalorder %s410_s13, %s404_s22 }
  0x4e   : > { %p407_p10 = pneg %p406_p13 }
  0x4f   : > { %p413_p0 = por %p412_p2, %p411_p1 }
  0x51   : > { %p414_p3 = pnand %p413_p0, %p407_p10 }
  0xd5   : > { %v182_v5 = vpop.xlane.xlu0 %181 }
  0xd6   : > { %v183_v6 = vadd.f32 1e-08, %v182_v5 }
  0xd8   : > { %348 = vrsqrt.f32 %v183_v6 }
  0xe5   : > { %v349_v7 = vpop.eup %348 }
  0xe6   : > { %v185_v8 = vmul.f32 %v349_v7, %v177_v2 }
  0xe8   : > { %186 = vst.msk [vmem:[%s168_s6] sm:$0xff] %vm179_vm0, %v185_v8 }
  0xe9   : > { %417 = shalt.err (!%p414_p3)
}
  0xea   : > { %s418_s25 = scalar_lea.hbm %s199_s19, 128  ;;  %s422_s30 = scalar_lea.hbm %s661_s2, 256 }
  0xeb   : > { %p419_p12 = scmp.ne.s32.totalorder %s199_s19, %s418_s25  ;;  %p423_p6 = scmp.lt.s32.totalorder %s199_s19, %s661_s2 }
  0xec   : > { %p424_p4 = scmp.lt.s32.totalorder %s422_s30, %s418_s25 }
  0xed   : > { %p420_p5 = pnand %p419_p12, %p678_p11 }
  0xee   : > { %p425_p8 = por %p424_p4, %p423_p6 }
  0xef   : > { %p421_p7 = pneg %p420_p5 }
  0xf1   : > { %p426_p9 = pnand %p425_p8, %p421_p7 }
  0xf3   : > { %429 = shalt.err (!%p426_p9)
}
  0xf4   : > { %297 = dma.vmem_to_hbm [thread:$0]  (%p678_p11), %s202_s8, 128, %s199_s19, %s188_s21  }
  0xf5 PF: > { %s213_s5 = sand.u32 1, %s460_s9   ;;  %p679_p13 = scmp.ne.s32.totalorder %s667_s16, 0 }
  0xf6   : > { %p680_p10 = scmp.ge.s32.totalorder %s472_s12, 2  ;;  %s214_s7 = scalar_lea.sflag [#allocation4], %s213_s5 }
  0xf8   : > { %p308_p1 = pnand %p680_p10, %p679_p13 }
  0xfa   : > { %p309_p2 = pneg %p308_p1 }
  0xfc   : > { %455 = dma.done.wait (%p309_p2), %s214_s7, 128  }
  0xfd   : > { %457 = vsyncadd (%p309_p2), %s214_s7, 4294967168  ;;  %p16_p0 = scmp.ge.s32.totalorder %s540_s20, 4   ;;  %s681_s9 = smov %s464_s10 }
  0xfe   : > { %s682_s10 = smov %s468_s11  ;;  %s683_s11 = smov %s567_s28 }
  0xff   : > { %s684_s12 = smov %s540_s20  ;;  %18 = sbr.rel (!%p16_p0) target bundleno = 6 (0x6), region = 77 }
 0x104   :  { %219 = vsyncpa [#allocation3], 1 }
 0x105   :  { %221 = vsyncpa [#allocation3 + $0x1], 1 }
 0x106   :  { %222 = vsyncpa [#allocation6], 1 }
 0x107   :  { %223 = vsyncpa [#allocation4], 1 }
 0x108   :  { %225 = vsyncpa [#allocation4 + $0x1], 1 }

</bundles_post_ra>
